<compile_context>
chip_gen: v7x
topology: tpu7x:2x2x1
jax: 0.10.0
libtpu: 0.0.40
codegen_flags: <defaults>
</compile_context>

<pallas_src>
import functools

import jax
import jax.numpy as jnp
from jax.experimental import pallas as pl
from jax.experimental.pallas import tpu as pltpu

JACCARD_THRESH = 0.5
NEGPOS_RATIO = 3
VARIANCES = (0.1, 0.2)

_LANES = 128     # TPU vreg lane width; D is padded to a multiple of this
_J_CHUNK = 128   # hard-negative-mining j-chunk (live block is [128, Dp])


# -----------------------------------------------------------------------------
# Pallas kernel: everything after `match()` in the PyTorch forward, per image.
# -----------------------------------------------------------------------------
def _multibox_loss_kernel(loc_p_ref, loc_t_ref, conf_ref, label_ref,
                          out_ref, ce_sc, *, d_real):
    """Per-image MultiBox loss partial sums (lane-dense: D maps to lanes).

    Block shapes:
      loc_p_ref / loc_t_ref : (1, 4, Dp)
      conf_ref              : (1, C, Dp)  native dtype, upcast here
      label_ref             : (1, 1, Dp)  int32, -1 marks padded anchors
      out_ref               : (1, 3, 128) rows = [loss_l, loss_c, num_pos]
      ce_sc                 : (1, Dp) f32 VMEM scratch (mining chunk source)
    """
    C = conf_ref.shape[1]
    Dp = conf_ref.shape[2]

    loc_p = loc_p_ref[0].astype(jnp.float32)          # (4, Dp)
    loc_t = loc_t_ref[0].astype(jnp.float32)          # (4, Dp)
    conf = conf_ref[0].astype(jnp.float32)            # (C, Dp)
    label = label_ref[0]                               # (1, Dp) int32

    pos = label > 0                                    # (1, Dp)
    valid = label >= 0                                 # padded anchors -> False
    pos_f = pos.astype(jnp.float32)

    # ---- localization loss: smooth L1 summed over positive anchors --------
    diff = loc_p - loc_t
    ad = jnp.abs(diff)
    sl1 = jnp.where(ad < 1.0, 0.5 * diff * diff, ad - 0.5)        # (4, Dp)
    loss_l = jnp.sum(sl1 * pos_f)

    # ---- per-anchor cross entropy: logsumexp(conf) - conf[label] ----------
    m = jnp.max(conf, axis=0, keepdims=True)                       # (1, Dp)
    lse = jnp.log(jnp.sum(jnp.exp(conf - m), axis=0, keepdims=True)) + m
    picked = jnp.zeros_like(lse)
    for c in range(C):                        # small unrolled class loop
        picked = picked + jnp.where(label == c, conf[c:c + 1, :], 0.0)
    ce = jnp.where(valid, lse - picked, 0.0)                       # (1, Dp)

    # ---- hard-negative mining: streamed descending-rank over j-chunks -----
    # rank[i] = #{j : v[j] > v[i]} + #{j : v[j] == v[i], j < i}
    ce_rank = jnp.where(pos, 0.0, ce)          # positives zeroed (as reference)
    ce_rank = jnp.where(valid, ce_rank, -1.0)  # padded anchors rank last
    ce_sc[...] = ce_rank
    lane_i = jax.lax.broadcasted_iota(jnp.int32, (1, Dp), 1)

    nchunks = Dp // _J_CHUNK

    def chunk_body(cj, acc):
        start = pl.multiple_of(cj * _J_CHUNK, _J_CHUNK)
        row = ce_sc[:, pl.ds(start, _J_CHUNK)]                     # (1, JC)
        # lane -> sublane move via a fully aligned (128,128) transpose
        vj = jnp.transpose(
            jnp.broadcast_to(row, (_J_CHUNK, _J_CHUNK)))[:, 0:1]   # (JC, 1)
        ij = start + jax.lax.broadcasted_iota(jnp.int32, (_J_CHUNK, 1), 0)
        above = jnp.logical_or(
            vj > ce_rank,
            jnp.logical_and(vj == ce_rank, ij < lane_i))           # (JC, Dp)
        return acc + jnp.sum(above.astype(jnp.float32), axis=0, keepdims=True)

    rank = jax.lax.fori_loop(0, nchunks, chunk_body,
                             jnp.zeros((1, Dp), jnp.float32))      # (1, Dp)

    num_pos = jnp.sum(pos_f)
    num_neg = jnp.minimum(num_pos * float(NEGPOS_RATIO), d_real)
    neg = rank < num_neg

    # ---- confidence loss over (pos | neg) valid anchors, sum reduction ----
    sel = jnp.logical_and(jnp.logical_or(pos, neg), valid)
    loss_c = jnp.sum(jnp.where(sel, ce, 0.0))

    out_ref[...] = jnp.concatenate(
        [jnp.full((1, 1, _LANES), loss_l, jnp.float32),
         jnp.full((1, 1, _LANES), loss_c, jnp.float32),
         jnp.full((1, 1, _LANES), num_pos, jnp.float32)], axis=1)


def _run_kernel(loc_data, conf_data, loc_t, conf_t_label):
    B, D, C = conf_data.shape
    Dp = ((D + _LANES - 1) // _LANES) * _LANES
    pad = Dp - D

    # Lane-dense layout: put the big D axis on lanes; keep conf native dtype.
    loc_p = jnp.transpose(loc_data, (0, 2, 1))               # [B, 4, D]
    loc_tt = jnp.transpose(loc_t, (0, 2, 1))                 # [B, 4, D]
    conf = jnp.transpose(conf_data, (0, 2, 1))               # [B, C, D]
    label = conf_t_label.astype(jnp.int32)[:, None, :]       # [B, 1, D]
    if pad:
        loc_p = jnp.pad(loc_p, ((0, 0), (0, 0), (0, pad)))
        loc_tt = jnp.pad(loc_tt, ((0, 0), (0, 0), (0, pad)))
        conf = jnp.pad(conf, ((0, 0), (0, 0), (0, pad)))
        label = jnp.pad(label, ((0, 0), (0, 0), (0, pad)), constant_values=-1)

    kernel = functools.partial(_multibox_loss_kernel, d_real=float(D))

    cost = pl.CostEstimate(
        flops=int(B * (4 * Dp * Dp + Dp * (6 * C + 24))),
        transcendentals=int(B * Dp * (C + 1)),
        bytes_accessed=int(loc_p.size * 4 + loc_tt.size * 4
                           + conf.size * conf.dtype.itemsize
                           + label.size * 4 + B * 3 * _LANES * 4))

    out = pl.pallas_call(
        kernel,
        out_shape=jax.ShapeDtypeStruct((B, 3, _LANES), jnp.float32),
        grid=(B,),
        in_specs=[
            pl.BlockSpec((1, 4, Dp), lambda b: (b, 0, 0)),
            pl.BlockSpec((1, 4, Dp), lambda b: (b, 0, 0)),
            pl.BlockSpec((1, C, Dp), lambda b: (b, 0, 0)),
            pl.BlockSpec((1, 1, Dp), lambda b: (b, 0, 0)),
        ],
        out_specs=pl.BlockSpec((1, 3, _LANES), lambda b: (b, 0, 0)),
        scratch_shapes=[pltpu.VMEM((1, Dp), jnp.float32)],
        compiler_params=pltpu.CompilerParams(
            dimension_semantics=("parallel",),
            vmem_limit_bytes=32 * 1024 * 1024),
        cost_estimate=cost,
    )(loc_p, loc_tt, conf, label)

    parts = out[:, :, 0]                                     # (B, 3)
    n = jnp.sum(parts[:, 2])
    # Matches reference semantics (divide by total positive count; the
    # zero-positive hazard exists in the PyTorch module as well).
    return jnp.sum(parts[:, 0]) / n, jnp.sum(parts[:, 1]) / n


# -----------------------------------------------------------------------------
# Plain-JAX glue: standard SSD match/encode (external `match()` in reference).
# -----------------------------------------------------------------------------
def _point_form(boxes):      # center form -> corner form
    return jnp.concatenate([boxes[:, :2] - boxes[:, 2:] / 2,
                            boxes[:, :2] + boxes[:, 2:] / 2], axis=1)


def _jaccard(box_a, box_b):  # [G,4] corner, [D,4] corner -> [G,D]
    max_xy = jnp.minimum(box_a[:, None, 2:], box_b[None, :, 2:])
    min_xy = jnp.maximum(box_a[:, None, :2], box_b[None, :, :2])
    wh = jnp.clip(max_xy - min_xy, 0.0)
    inter = wh[..., 0] * wh[..., 1]
    area_a = ((box_a[:, 2] - box_a[:, 0]) * (box_a[:, 3] - box_a[:, 1]))[:, None]
    area_b = ((box_b[:, 2] - box_b[:, 0]) * (box_b[:, 3] - box_b[:, 1]))[None, :]
    return inter / (area_a + area_b - inter)


def _match(truths, labels, dbox):
    G = truths.shape[0]
    overlaps = _jaccard(truths, _point_form(dbox))          # [G, D]
    best_prior_idx = jnp.argmax(overlaps, axis=1)           # [G]
    best_truth_overlap = jnp.max(overlaps, axis=0)          # [D]
    best_truth_idx = jnp.argmax(overlaps, axis=0)           # [D]
    best_truth_overlap = best_truth_overlap.at[best_prior_idx].set(2.0)
    best_truth_idx = best_truth_idx.at[best_prior_idx].set(jnp.arange(G))
    matches = truths[best_truth_idx]                        # [D, 4] corner
    conf = labels[best_truth_idx] + 1                       # background shift
    conf = jnp.where(best_truth_overlap < JACCARD_THRESH, 0, conf)
    g_cxcy = ((matches[:, :2] + matches[:, 2:]) / 2 - dbox[:, :2]) \
        / (VARIANCES[0] * dbox[:, 2:])
    g_wh = jnp.log((matches[:, 2:] - matches[:, :2]) / dbox[:, 2:]) \
        / VARIANCES[1]
    loc = jnp.concatenate([g_cxcy, g_wh], axis=1)           # [D, 4]
    return loc, conf.astype(jnp.int32)


@jax.jit
def multibox_loss(loc_data, conf_data, dbox_list, target_boxes, target_labels):
    loc_t, conf_t_label = jax.vmap(
        lambda tb, tl: _match(tb, tl, dbox_list))(target_boxes, target_labels)
    return _run_kernel(loc_data, conf_data, loc_t, conf_t_label)


# -----------------------------------------------------------------------------
if __name__ == "__main__":
    B, D, C, G = 2, 32, 4, 3     # batch, default boxes, classes, gt per image

    key = jax.random.PRNGKey(0)
    k1, k2, k3, k4, k5 = jax.random.split(key, 5)

    # predictions
    loc_data = 0.1 * jax.random.normal(k1, (B, D, 4), dtype=jnp.float32)
    conf_data = jax.random.normal(k2, (B, D, C), dtype=jnp.float32)

    # default boxes in center form (cx, cy, w, h), deterministic grid
    gx = (jnp.arange(8, dtype=jnp.float32) + 0.5) / 8.0
    gy = (jnp.arange(4, dtype=jnp.float32) + 0.5) / 4.0
    cx, cy = jnp.meshgrid(gx, gy, indexing="xy")
    dbox_list = jnp.stack(
        [cx.reshape(-1), cy.reshape(-1),
         jnp.full((D,), 0.25), jnp.full((D,), 0.25)], axis=1)        # [D, 4]

    # ground-truth targets: corner-form boxes in [0,1] + integer labels
    xymin = jax.random.uniform(k3, (B, G, 2), minval=0.05, maxval=0.55)
    wh = jax.random.uniform(k4, (B, G, 2), minval=0.15, maxval=0.35)
    target_boxes = jnp.concatenate(
        [xymin, jnp.clip(xymin + wh, 0.0, 1.0)], axis=2)             # [B, G, 4]
    target_labels = jax.random.randint(k5, (B, G), 0, C - 1, dtype=jnp.int32)

    loss_l, loss_c = multibox_loss(loc_data, conf_data, dbox_list,
                                   target_boxes, target_labels)
    jax.block_until_ready((loss_l, loss_c))
    assert jnp.isfinite(loss_l) and jnp.isfinite(loss_c)
    print("KERNEL_OK")
</pallas_src>

<mosaic_0001>
module attributes {stable_mosaic.version = 11 : i64} {
  func.func @_multibox_loss_kernel(%arg0: i32, %arg1: memref<1x4x128xf32, #tpu.memory_space<vmem>>, %arg2: memref<1x4x128xf32, #tpu.memory_space<vmem>>, %arg3: memref<1x4x128xf32, #tpu.memory_space<vmem>>, %arg4: memref<1x1x128xi32, #tpu.memory_space<vmem>>, %arg5: memref<1x3x128xf32, #tpu.memory_space<vmem>>, %arg6: memref<1x128xf32, #tpu.memory_space<vmem>>) attributes {dimension_semantics = [#tpu.dimension_semantics<parallel>], iteration_bounds = array<i64: 2>, scalar_prefetch = 0 : i64, scratch_operands = 1 : i64, tpu.core_type = #tpu.core_type<tc>, window_params = [{transform_indices = @transform_0, window_bounds = array<i64: 1, 4, 128>}, {transform_indices = @transform_1, window_bounds = array<i64: 1, 4, 128>}, {transform_indices = @transform_2, window_bounds = array<i64: 1, 4, 128>}, {transform_indices = @transform_3, window_bounds = array<i64: 1, 1, 128>}, {transform_indices = @transform_4, window_bounds = array<i64: 1, 3, 128>}]} {
    %c0 = arith.constant 0 : index
    %c0_0 = arith.constant 0 : index
    %c0_1 = arith.constant 0 : index
    %0 = vector.load %arg1[%c0, %c0_0, %c0_1] : memref<1x4x128xf32, #tpu.memory_space<vmem>>, vector<1x4x128xf32>
    %1 = vector.shape_cast %0 : vector<1x4x128xf32> to vector<4x128xf32>
    %c0_2 = arith.constant 0 : index
    %c0_3 = arith.constant 0 : index
    %c0_4 = arith.constant 0 : index
    %2 = vector.load %arg2[%c0_2, %c0_3, %c0_4] : memref<1x4x128xf32, #tpu.memory_space<vmem>>, vector<1x4x128xf32>
    %3 = vector.shape_cast %2 : vector<1x4x128xf32> to vector<4x128xf32>
    %c0_5 = arith.constant 0 : index
    %c0_6 = arith.constant 0 : index
    %c0_7 = arith.constant 0 : index
    %4 = vector.load %arg3[%c0_5, %c0_6, %c0_7] : memref<1x4x128xf32, #tpu.memory_space<vmem>>, vector<1x4x128xf32>
    %5 = vector.shape_cast %4 : vector<1x4x128xf32> to vector<4x128xf32>
    %c0_8 = arith.constant 0 : index
    %c0_9 = arith.constant 0 : index
    %c0_10 = arith.constant 0 : index
    %6 = vector.load %arg4[%c0_8, %c0_9, %c0_10] : memref<1x1x128xi32, #tpu.memory_space<vmem>>, vector<1x1x128xi32>
    %7 = vector.shape_cast %6 : vector<1x1x128xi32> to vector<1x128xi32>
    %c0_i32 = arith.constant 0 : i32
    %8 = vector.broadcast %c0_i32 : i32 to vector<1x128xi32>
    %9 = arith.cmpi sgt, %7, %8 : vector<1x128xi32>
    %c0_i32_11 = arith.constant 0 : i32
    %10 = vector.broadcast %c0_i32_11 : i32 to vector<1x128xi32>
    %11 = arith.cmpi sge, %7, %10 : vector<1x128xi32>
    %12 = arith.extui %9 : vector<1x128xi1> to vector<1x128xi32>
    %13 = arith.sitofp %12 : vector<1x128xi32> to vector<1x128xf32>
    %14 = arith.subf %1, %3 : vector<4x128xf32>
    %15 = math.absf %14 : vector<4x128xf32>
    %cst = arith.constant 1.000000e+00 : f32
    %16 = vector.broadcast %cst : f32 to vector<4x128xf32>
    %17 = arith.cmpf olt, %15, %16 : vector<4x128xf32>
    %cst_12 = arith.constant 5.000000e-01 : f32
    %18 = vector.broadcast %cst_12 : f32 to vector<4x128xf32>
    %19 = arith.mulf %18, %14 : vector<4x128xf32>
    %20 = arith.mulf %19, %14 : vector<4x128xf32>
    %cst_13 = arith.constant 5.000000e-01 : f32
    %21 = vector.broadcast %cst_13 : f32 to vector<4x128xf32>
    %22 = arith.subf %15, %21 : vector<4x128xf32>
    %23 = arith.select %17, %20, %22 : vector<4x128xi1>, vector<4x128xf32>
    %24 = vector.broadcast %13 : vector<1x128xf32> to vector<4x128xf32>
    %25 = arith.mulf %23, %24 : vector<4x128xf32>
    %26 = vector.shape_cast %25 : vector<4x128xf32> to vector<1x4x128xf32>
    %cst_14 = arith.constant dense<0.000000e+00> : vector<1xf32>
    %27 = vector.multi_reduction <add>, %26, %cst_14 [1, 2] : vector<1x4x128xf32> to vector<1xf32>
    %28 = vector.shape_cast %27 : vector<1xf32> to vector<1x1x1xf32>
    %29 = vector.extract %28[0, 0, 0] : f32 from vector<1x1x1xf32>
    %cst_15 = arith.constant dense<0xFF800000> : vector<128xf32>
    %30 = vector.multi_reduction <maximumf>, %5, %cst_15 [0] : vector<4x128xf32> to vector<128xf32>
    %31 = vector.shape_cast %30 : vector<128xf32> to vector<1x128xf32>
    %32 = vector.broadcast %31 : vector<1x128xf32> to vector<4x128xf32>
    %33 = arith.subf %5, %32 : vector<4x128xf32>
    %34 = math.exp %33 : vector<4x128xf32>
    %cst_16 = arith.constant dense<0.000000e+00> : vector<128xf32>
    %35 = vector.multi_reduction <add>, %34, %cst_16 [0] : vector<4x128xf32> to vector<128xf32>
    %36 = vector.shape_cast %35 : vector<128xf32> to vector<1x128xf32>
    %37 = math.log %36 : vector<1x128xf32>
    %38 = arith.addf %37, %31 : vector<1x128xf32>
    %cst_17 = arith.constant 0.000000e+00 : f32
    %39 = vector.broadcast %cst_17 : f32 to vector<1x128xf32>
    %c0_i32_18 = arith.constant 0 : i32
    %40 = vector.broadcast %c0_i32_18 : i32 to vector<1x128xi32>
    %41 = arith.cmpi eq, %7, %40 : vector<1x128xi32>
    %42 = vector.extract_strided_slice %5 {offsets = [0, 0], sizes = [1, 128], strides = [1, 1]} : vector<4x128xf32> to vector<1x128xf32>
    %cst_19 = arith.constant 0.000000e+00 : f32
    %43 = vector.broadcast %cst_19 : f32 to vector<1x128xf32>
    %44 = arith.select %41, %42, %43 : vector<1x128xi1>, vector<1x128xf32>
    %45 = arith.addf %39, %44 : vector<1x128xf32>
    %c1_i32 = arith.constant 1 : i32
    %46 = vector.broadcast %c1_i32 : i32 to vector<1x128xi32>
    %47 = arith.cmpi eq, %7, %46 : vector<1x128xi32>
    %48 = vector.extract_strided_slice %5 {offsets = [1, 0], sizes = [1, 128], strides = [1, 1]} : vector<4x128xf32> to vector<1x128xf32>
    %cst_20 = arith.constant 0.000000e+00 : f32
    %49 = vector.broadcast %cst_20 : f32 to vector<1x128xf32>
    %50 = arith.select %47, %48, %49 : vector<1x128xi1>, vector<1x128xf32>
    %51 = arith.addf %45, %50 : vector<1x128xf32>
    %c2_i32 = arith.constant 2 : i32
    %52 = vector.broadcast %c2_i32 : i32 to vector<1x128xi32>
    %53 = arith.cmpi eq, %7, %52 : vector<1x128xi32>
    %54 = vector.extract_strided_slice %5 {offsets = [2, 0], sizes = [1, 128], strides = [1, 1]} : vector<4x128xf32> to vector<1x128xf32>
    %cst_21 = arith.constant 0.000000e+00 : f32
    %55 = vector.broadcast %cst_21 : f32 to vector<1x128xf32>
    %56 = arith.select %53, %54, %55 : vector<1x128xi1>, vector<1x128xf32>
    %57 = arith.addf %51, %56 : vector<1x128xf32>
    %c3_i32 = arith.constant 3 : i32
    %58 = vector.broadcast %c3_i32 : i32 to vector<1x128xi32>
    %59 = arith.cmpi eq, %7, %58 : vector<1x128xi32>
    %60 = vector.extract_strided_slice %5 {offsets = [3, 0], sizes = [1, 128], strides = [1, 1]} : vector<4x128xf32> to vector<1x128xf32>
    %cst_22 = arith.constant 0.000000e+00 : f32
    %61 = vector.broadcast %cst_22 : f32 to vector<1x128xf32>
    %62 = arith.select %59, %60, %61 : vector<1x128xi1>, vector<1x128xf32>
    %63 = arith.addf %57, %62 : vector<1x128xf32>
    %64 = arith.subf %38, %63 : vector<1x128xf32>
    %cst_23 = arith.constant 0.000000e+00 : f32
    %65 = vector.broadcast %cst_23 : f32 to vector<1x128xf32>
    %66 = arith.select %11, %64, %65 : vector<1x128xi1>, vector<1x128xf32>
    %cst_24 = arith.constant 0.000000e+00 : f32
    %67 = vector.broadcast %cst_24 : f32 to vector<1x128xf32>
    %68 = arith.select %9, %67, %66 : vector<1x128xi1>, vector<1x128xf32>
    %cst_25 = arith.constant -1.000000e+00 : f32
    %69 = vector.broadcast %cst_25 : f32 to vector<1x128xf32>
    %70 = arith.select %11, %68, %69 : vector<1x128xi1>, vector<1x128xf32>
    %c0_26 = arith.constant 0 : index
    %c0_27 = arith.constant 0 : index
    %71 = vector.load %arg6[%c0_26, %c0_27] : memref<1x128xf32, #tpu.memory_space<vmem>>, vector<1x128xf32>
    tpu.vector_store %arg6[%c0_26, %c0_27], %70 {strides = array<i32>} : memref<1x128xf32, #tpu.memory_space<vmem>>, vector<1x128xf32>,
    %72 = tpu.iota {dimensions = array<i32: 1>} : vector<1x128xi32>
    %cst_28 = arith.constant 0.000000e+00 : f32
    %73 = vector.broadcast %cst_28 : f32 to vector<1x128xf32>
    %c0_i32_29 = arith.constant 0 : i32
    %c128_i32 = arith.constant 128 : i32
    %74 = arith.muli %c0_i32_29, %c128_i32 : i32
    %75 = tpu.assume_multiple %74, 128 : i32
    %c0_30 = arith.constant 0 : index
    %76 = arith.index_cast %75 : i32 to index
    %77 = vector.load %arg6[%c0_30, %76] : memref<1x128xf32, #tpu.memory_space<vmem>>, vector<1x128xf32>
    %78 = vector.shape_cast %77 : vector<1x128xf32> to vector<1x128xf32>
    %79 = vector.broadcast %78 : vector<1x128xf32> to vector<128x128xf32>
    %80 = tpu.transpose %79, [1, 0] : vector<128x128xf32> -> vector<128x128xf32>
    %81 = vector.extract_strided_slice %80 {offsets = [0, 0], sizes = [128, 1], strides = [1, 1]} : vector<128x128xf32> to vector<128x1xf32>
    %82 = tpu.iota {dimensions = array<i32: 0>} : vector<128x1xi32>
    %83 = vector.broadcast %75 : i32 to vector<128x1xi32>
    %84 = arith.addi %83, %82 : vector<128x1xi32>
    %85 = vector.broadcast %81 : vector<128x1xf32> to vector<128x128xf32>
    %86 = vector.broadcast %70 : vector<1x128xf32> to vector<128x128xf32>
    %87 = arith.cmpf ogt, %85, %86 : vector<128x128xf32>
    %88 = vector.broadcast %81 : vector<128x1xf32> to vector<128x128xf32>
    %89 = vector.broadcast %70 : vector<1x128xf32> to vector<128x128xf32>
    %90 = arith.cmpf oeq, %88, %89 : vector<128x128xf32>
    %91 = vector.broadcast %84 : vector<128x1xi32> to vector<128x128xi32>
    %92 = vector.broadcast %72 : vector<1x128xi32> to vector<128x128xi32>
    %93 = arith.cmpi slt, %91, %92 : vector<128x128xi32>
    %94 = arith.andi %90, %93 : vector<128x128xi1>
    %95 = arith.ori %87, %94 : vector<128x128xi1>
    %96 = arith.extui %95 : vector<128x128xi1> to vector<128x128xi32>
    %97 = arith.sitofp %96 : vector<128x128xi32> to vector<128x128xf32>
    %cst_31 = arith.constant dense<0.000000e+00> : vector<128xf32>
    %98 = vector.multi_reduction <add>, %97, %cst_31 [0] : vector<128x128xf32> to vector<128xf32>
    %99 = vector.shape_cast %98 : vector<128xf32> to vector<1x128xf32>
    %100 = arith.addf %73, %99 : vector<1x128xf32>
    %c1_i32_32 = arith.constant 1 : i32
    %101 = vector.shape_cast %13 : vector<1x128xf32> to vector<1x1x128xf32>
    %cst_33 = arith.constant dense<0.000000e+00> : vector<1xf32>
    %102 = vector.multi_reduction <add>, %101, %cst_33 [1, 2] : vector<1x1x128xf32> to vector<1xf32>
    %103 = vector.shape_cast %102 : vector<1xf32> to vector<1x1x1xf32>
    %104 = vector.extract %103[0, 0, 0] : f32 from vector<1x1x1xf32>
    %cst_34 = arith.constant 3.000000e+00 : f32
    %105 = arith.mulf %104, %cst_34 : f32
    %cst_35 = arith.constant 3.200000e+01 : f32
    %106 = arith.minimumf %105, %cst_35 : f32
    %107 = vector.broadcast %106 : f32 to vector<1x128xf32>
    %108 = arith.cmpf olt, %100, %107 : vector<1x128xf32>
    %109 = arith.ori %9, %108 : vector<1x128xi1>
    %110 = arith.andi %109, %11 : vector<1x128xi1>
    %cst_36 = arith.constant 0.000000e+00 : f32
    %111 = vector.broadcast %cst_36 : f32 to vector<1x128xf32>
    %112 = arith.select %110, %66, %111 : vector<1x128xi1>, vector<1x128xf32>
    %113 = vector.shape_cast %112 : vector<1x128xf32> to vector<1x1x128xf32>
    %cst_37 = arith.constant dense<0.000000e+00> : vector<1xf32>
    %114 = vector.multi_reduction <add>, %113, %cst_37 [1, 2] : vector<1x1x128xf32> to vector<1xf32>
    %115 = vector.shape_cast %114 : vector<1xf32> to vector<1x1x1xf32>
    %116 = vector.extract %115[0, 0, 0] : f32 from vector<1x1x1xf32>
    %117 = vector.broadcast %29 : f32 to vector<1x1x128xf32>
    %118 = vector.broadcast %116 : f32 to vector<1x1x128xf32>
    %119 = vector.broadcast %104 : f32 to vector<1x1x128xf32>
    %120 = tpu.concatenate %117, %118, %119 in 1 : vector<1x1x128xf32>, vector<1x1x128xf32>, vector<1x1x128xf32> -> vector<1x3x128xf32>
    %c0_38 = arith.constant 0 : index
    %c0_39 = arith.constant 0 : index
    %c0_40 = arith.constant 0 : index
    %121 = vector.load %arg5[%c0_38, %c0_39, %c0_40] : memref<1x3x128xf32, #tpu.memory_space<vmem>>, vector<1x3x128xf32>
    tpu.vector_store %arg5[%c0_38, %c0_39, %c0_40], %120 {strides = array<i32>} : memref<1x3x128xf32, #tpu.memory_space<vmem>>, vector<1x3x128xf32>,
    return
  }
  func.func @transform_0(%arg0: i32) -> (i32, i32, i32) {
    %c0_i32 = arith.constant 0 : i32
    %c0_i32_0 = arith.constant 0 : i32
    %c0_i32_1 = arith.constant 0 : i32
    return %arg0, %c0_i32, %c0_i32_0 : i32, i32, i32
  }
  func.func @transform_1(%arg0: i32) -> (i32, i32, i32) {
    %c0_i32 = arith.constant 0 : i32
    %c0_i32_0 = arith.constant 0 : i32
    %c0_i32_1 = arith.constant 0 : i32
    return %arg0, %c0_i32, %c0_i32_0 : i32, i32, i32
  }
  func.func @transform_2(%arg0: i32) -> (i32, i32, i32) {
    %c0_i32 = arith.constant 0 : i32
    %c0_i32_0 = arith.constant 0 : i32
    %c0_i32_1 = arith.constant 0 : i32
    return %arg0, %c0_i32, %c0_i32_0 : i32, i32, i32
  }
  func.func @transform_3(%arg0: i32) -> (i32, i32, i32) {
    %c0_i32 = arith.constant 0 : i32
    %c0_i32_0 = arith.constant 0 : i32
    %c0_i32_1 = arith.constant 0 : i32
    return %arg0, %c0_i32, %c0_i32_0 : i32, i32, i32
  }
  func.func @transform_4(%arg0: i32) -> (i32, i32, i32) {
    %c0_i32 = arith.constant 0 : i32
    %c0_i32_0 = arith.constant 0 : i32
    %c0_i32_1 = arith.constant 0 : i32
    return %arg0, %c0_i32, %c0_i32_0 : i32, i32, i32
  }
}

</mosaic_0001>

<bundles_post_ra>
// kernel: multibox_loss.1
= control target key start
LH: loop header
LB: loop body
LE: loop exit
PB: predicated region body
PF: predicated region fallthrough
CT: control target
= control target key end

     0   :  { %s846_s15 = smov 0   ;;  %s1020_s0 = inlined_call_operand.vmem [shape: f32[2,4,128], index: 0, kind: input, shape index: {}]   ;;  %s1021_s1 = inlined_call_operand.vmem [shape: f32[2,4,128], index: 1, kind: input, shape index: {}]   ;;  %s1022_s2 = inlined_call_operand.vmem [shape: f32[2,4,128], index: 2, kind: input, shape index: {}]   ;;  %s1023_s3 = inlined_call_operand.vmem [shape: s32[2,1,128], index: 3, kind: input, shape index: {}]   ;;  %s1024_s4 = inlined_call_operand.vmem [shape: f32[2,3,128], index: 4, kind: output, shape index: {}]  }
   0x1 LB: > { %s755_s16 = sadd.s32 4294967295, %s815_s15   ;;  %p759_p0 = scmp.ge.s32.totalorder %s815_s15, 1  ;;  %s815_s15 = sphi %s846_s15, %s14_s15  }
   0x2   : > { %p187_p1 = scmp.lt.s32.totalorder %s815_s15, 3 }
   0x4   : > { %p188_p2 = pnand %p759_p0, %p187_p1 }
   0x5   : > { %p222_p3 = scmp.lt.s32.totalorder (!%p188_p2), %s755_s16, 1  ;;  %v257_v0 = vlaneseq (!%p188_p2)  ;;  %vm263_vm0 = vcmask (!%p188_p2), 1043456   ;;  %v817_v11 = vmov (!%p188_p2), 0.0   ;;  %v818_v16 = vmov (!%p188_p2), 0   ;;  %s820_s7 = smov (!%p188_p2), 32.0  }
   0x6   : > { %191 = sbr.rel (%p188_p2) target bundleno = 634 (0x27a), region = 36  ;;  %803 = vset.pattern.permute.xlu1 (!%p188_p2), %v818_v16  ;;  %vm1025_vm3 = vcmask (!%p188_p2), 1040384   ;;  %v819_v29 = vmov (!%p188_p2), 1966171168  }
   0x7   : > { %v865_v3 = vshrl.u32 (!%p188_p2), %v257_v0, 7  ;;  %v300_v30 = vunpack.c.l.s4 (!%p188_p2), %v819_v29 }
   0x9   : > { %v259_v10 = vsub.s32 (!%p188_p2), 0, %v865_v3  ;;  %v301_v31 = vunpack.c.0.s8 (!%p188_p2), %v300_v30 }
   0xb   : > { %v304_v32 = vsub.s32 (!%p188_p2), %v301_v31, %v865_v3 }
   0xd   : > { %s1036_s16 = smov (!%p222_p3, %s755_s16), 1 }
   0xe   : > { %s854_s17 = sshll.u32 %s1036_s16, 2  ;;  %s236_s23 = scalar_lea.vmem %s1023_s3, %s1036_s16 }
   0xf   : > { %s233_s20 = scalar_lea.vmem %s1022_s2, %s854_s17  ;;  %s225_s26 = scalar_lea.vmem %s1020_s0, %s854_s17  ;;  %v875_v5 = vld [vmem:[%s236_s23] sm:$0x1] }
  0x10   : > { %v243_v1 = vld [vmem:[%s233_s20] sm:$0xf]  ;;  %s229_s29 = scalar_lea.vmem %s1021_s1, %s854_s17  ;;  %vm1027_vm1 = vcmp.gt.s32.totalorder %v875_v5, 0  ;;  %vm294_vm4 = vcmp.eq.s32.totalorder %v875_v5, 0  ;;  %vm297_vm5 = vcmp.eq.s32.totalorder %v875_v5, 1  ;;  %vm324_vm6 = vcmp.eq.s32.totalorder %v875_v5, 2  ;;  %s240_s12 = scalar_lea.vmem %s1024_s4, %s854_s17 }
  0x11   : > { %v274_v2 = vsel %vm263_vm0, %v243_v1, -inf  ;;  %v241_v6 = vld [vmem:[%s225_s26] sm:$0xf]  ;;  %v764_v12 = vsel %vm1027_vm1, 1.0, %v817_v11  ;;  %v305_v36 = vrot.slane %v243_v1, %v304_v32  ;;  %v295_v45 = vsel %vm294_vm4, %v243_v1, 0.0 }
  0x12   : > { %v275_v4 = vrot.slane %v274_v2, 4  ;;  %v242_v7 = vld [vmem:[%s229_s29] sm:$0xf]  ;;  %v260_v19 = vrot.slane %v764_v12, %v259_v10  ;;  %v635_v28 = vsel %vm1025_vm3, %v764_v12, 0.0  ;;  %vm329_vm7 = vcmp.eq.s32.totalorder %v875_v5, 3 }
  0x13   : > { %v249_v9 = vsub.f32 %v241_v6, %v242_v7  ;;  %v306_v39 = vcombine.high %v305_v36, %v305_v36  ;;  %v313_v42 = vrot.slane %v305_v36, %v304_v32  ;;  %vm1026_vm8 = vcmp.ge.s32.totalorder %v875_v5, 0 }
  0x14   : > { %v276_v8 = vmax.f32 %v274_v2, %v275_v4 }
  0x15   : > { %v250_v14 = vand.u32 2147483647, %v249_v9  ;;  %v252_v15 = vmul.f32 0.5, %v249_v9  ;;  %v320_v43 = vrot.slane %v306_v39, %v304_v32  ;;  %v325_v47 = vcombine.high %v313_v42, %v313_v42 }
  0x16   : > { %v277_v13 = vrot.slane %v276_v8, 2 }
  0x17   : > { %vm251_vm2 = vcmp.lt.f32.partialorder %v250_v14, 1.0  ;;  %v253_v18 = vmul.f32 %v252_v15, %v249_v9  ;;  %v765_v20 = vadd.f32 -0.5, %v250_v14  ;;  %v322_v46 = vsel %vm297_vm5, %v320_v43, 0.0 }
  0x18   : > { %v278_v17 = vmax.f32 %v276_v8, %v277_v13  ;;  %v323_v48 = vadd.f32 %v322_v46, %v295_v45  ;;  %v327_v49 = vsel %vm324_vm6, %v325_v47, 0.0  ;;  %v330_v50 = vcombine.high %v320_v43, %v320_v43 }
  0x19   : > { %v255_v22 = vsel %vm251_vm2, %v253_v18, %v765_v20  ;;  %v384_v43 = vadd.s32 24, %v865_v3  ;;  %v1028_v45 = vmov 0  ;;  %v386_v46 = vadd.s32 40, %v865_v3 }
  0x1a   : > { %v279_v21 = vrot.slane %v278_v17, 1  ;;  %v262_v24 = vmul.f32 %v260_v19, %v255_v22  ;;  %v328_v51 = vadd.f32 %v327_v49, %v323_v48  ;;  %v332_v52 = vsel %vm329_vm7, %v330_v50, 0.0 }
  0x1b   : > { %v387_v47 = vadd.s32 48, %v865_v3  ;;  %v388_v49 = vadd.s32 56, %v865_v3 }
  0x1c   : > { %v280_v23 = vmax.f32 %v278_v17, %v279_v21  ;;  %v264_v26 = vsel %vm263_vm0, %v262_v24, 0.0  ;;  %v333_v55 = vadd.f32 %v332_v52, %v328_v51  ;;  %v389_v51 = vadd.s32 64, %v865_v3 }
  0x1d   : > { %265 = vadd.xlane.f32.xlu1 %v264_v26 }
  0x1e   : > { %v281_v25 = vsub.f32 %v243_v1, %v280_v23 }
  0x20   : > { %v282_v27 = vmul.f32 1.442695, %v281_v25 }
  0x21   : > { %636 = vadd.xlane.f32.xlu1 %v635_v28 }
  0x22   : > { %805 = vpow2.f32 %v282_v27 }
  0x2c   : > { %v806_v33 = vpop.eup %805 }
  0x2d   : > { %v284_v34 = vsel %vm263_vm0, %v806_v33, 0.0 }
  0x2e   : > { %v285_v35 = vrot.slane %v284_v34, 4 }
  0x30   : > { %v286_v37 = vadd.f32 %v285_v35, %v284_v34 }
  0x32   : > { %v287_v38 = vrot.slane %v286_v37, 2 }
  0x34   : > { %v288_v40 = vadd.f32 %v287_v38, %v286_v37  ;;  %v909_v38 = vand.u32 127, %v257_v0  ;;  %v385_v0 = vadd.s32 32, %v865_v3 }
  0x36   : > { %v289_v41 = vrot.slane %v288_v40, 1  ;;  %vm532_vm9 = vcmp.lt.s32.totalorder %v865_v3, %v909_v38  ;;  %vm535_vm6 = vcmp.lt.s32.totalorder %v384_v43, %v909_v38 }
  0x38   : > { %v290_v44 = vadd.f32 %v289_v41, %v288_v40  ;;  %v382_v40 = vadd.s32 8, %v865_v3  ;;  %v383_v41 = vadd.s32 16, %v865_v3 }
  0x3a   : > { %807 = vlog2.f32 %v290_v44  ;;  %vm533_vm11 = vcmp.lt.s32.totalorder %v382_v40, %v909_v38  ;;  %vm534_vm15 = vcmp.lt.s32.totalorder %v383_v41, %v909_v38 }
  0x44   : > { %v808_v53 = vpop.eup %807 }
  0x45   : > { %v292_v54 = vmul.f32 0.6931472, %v808_v53 }
  0x47   : > { %v293_v56 = vadd.f32 %v292_v54, %v280_v23 }
  0x49   : > { %v334_v57 = vsub.f32 %v293_v56, %v333_v55  ;;  %v390_v56 = vadd.s32 72, %v865_v3 }
  0x4b   : > { %v896_v58 = vsel %vm1026_vm8, %v334_v57, 0.0 }
  0x4c   : > { %v336_v59 = vsel %vm1027_vm1, 0.0, %v896_v58 }
  0x4d   : > { %v337_v60 = vsel %vm1026_vm8, %v336_v59, -1.0  ;;  %vm536_vm8 = vcmp.lt.s32.totalorder %v385_v0, %v909_v38 }
  0x4e   : > { %338 = vst [vmem:[#allocation2] sm:$0x1] %v337_v60  ;;  %v905_v61 = vrot.slane %v337_v60, %v259_v10  ;;  %v391_v60 = vadd.s32 80, %v865_v3 }
  0x55   : > { %v766_v62 = vld [vmem:[#allocation2] ss:$0 sm:$0xff] }
  0x56   : > { %348 = vxpose.xlu0.b32.start [1/16] %v766_v62, 128 }
  0x5a   : > { %349 = vxpose.xlu0.b32.cont [2/16] %v766_v62, 128 }
  0x5e   : > { %350 = vxpose.xlu0.b32.cont [3/16] %v766_v62, 128 }
  0x62   : > { %351 = vxpose.xlu0.b32.cont [4/16] %v766_v62, 128 }
  0x66   : > { %352 = vxpose.xlu0.b32.cont [5/16] %v766_v62, 128 }
  0x6a   : > { %353 = vxpose.xlu0.b32.cont [6/16] %v766_v62, 128 }
  0x6e   : > { %354 = vxpose.xlu0.b32.cont [7/16] %v766_v62, 128 }
  0x72   : > { %355 = vxpose.xlu0.b32.cont [8/16] %v766_v62, 128 }
  0x76   : > { %356 = vxpose.xlu0.b32.cont [9/16] %v766_v62, 128 }
  0x7a   : > { %357 = vxpose.xlu0.b32.cont [10/16] %v766_v62, 128 }
  0x7e   : > { %358 = vxpose.xlu0.b32.cont [11/16] %v766_v62, 128 }
  0x82   : > { %359 = vxpose.xlu0.b32.cont [12/16] %v766_v62, 128 }
  0x86   : > { %360 = vxpose.xlu0.b32.cont [13/16] %v766_v62, 128 }
  0x8a   : > { %361 = vxpose.xlu0.b32.cont [14/16] %v766_v62, 128 }
  0x8e   : > { %362 = vxpose.xlu0.b32.cont [15/16] %v766_v62, 128 }
  0x92   : > { %363 = vxpose.xlu0.b32.end [16/16] %v766_v62, 128 }
  0xaa   : > { %v266_v63 = vpop.xlane.xlu1 %265 }
  0xab   : > { %v267_v1 = vrot.slane %v266_v63, 4 }
  0xad   : > { %v268_v4 = vadd.f32 %v267_v1, %v266_v63 }
  0xae   : > { %v637_v2 = vpop.xlane.xlu1 %636 }
  0xaf   : > { %v638_v6 = vrot.slane %v637_v2, 4  ;;  %v269_v7 = vrot.slane %v268_v4, 2 }
  0xb1   : > { %v639_v8 = vadd.f32 %v638_v6, %v637_v2  ;;  %v270_v10 = vadd.f32 %v269_v7, %v268_v4  ;;  %v392_v2 = vadd.s32 88, %v865_v3  ;;  %v393_v7 = vadd.s32 96, %v865_v3 }
  0xb3   : > { %v640_v9 = vrot.slane %v639_v8, 2  ;;  %v271_v12 = vrot.slane %v270_v10, 1 }
  0xb5   : > { %v272_v14 = vadd.f32 %v271_v12, %v270_v10  ;;  %v641_v15 = vadd.f32 %v640_v9, %v639_v8 }
  0xb7   : > { %785 = vpush %v272_v14  ;;  %v642_v17 = vrot.slane %v641_v15, 1  ;;  %v394_v14 = vadd.s32 104, %v865_v3 }
  0xb9   : > { %v643_v19 = vadd.f32 %v642_v17, %v641_v15 }
  0xbb   : > { %804 = vset.pattern.permute.xlu0 %v818_v16  ;;  %787 = vpush %v643_v19 }
  0xd6   : > { %v364_v13 = vpop.trf.xlu0 }
  0xd7   : > { %416 = vperm.xlu1 %803, %v364_v13  }
  0xda   : > { %v365_v18 = vpop.trf.xlu0 }
  0xdb   : > { %421 = vperm.xlu1 %803, %v365_v18  }
  0xde   : > { %v366_v16 = vpop.trf.xlu0 }
  0xdf   : > { %426 = vperm.xlu1 %803, %v366_v16  }
  0xe2   : > { %v367_v20 = vpop.trf.xlu0 }
  0xe3   : > { %431 = vperm.xlu1 %803, %v367_v20   ;;  %v395_v20 = vadd.s32 112, %v865_v3 }
  0xe6   : > { %v368_v21 = vpop.trf.xlu0 }
  0xe7   : > { %436 = vperm.xlu1 %803, %v368_v21  }
  0xe8   : > { %s999_s30 = spop %785 }
  0xea   : > { %v369_v22 = vpop.trf.xlu0 }
  0xeb   : > { %441 = vperm.xlu1 %803, %v369_v22  }
  0xec   : > { %s1001_s5 = spop %787 }
  0xed   : > { %s645_s6 = smul.f32 3.0, %s1001_s5 }
  0xee   : > { %v370_v23 = vpop.trf.xlu0 }
  0xef   : > { %446 = vperm.xlu1 %803, %v370_v23   ;;  %s646_s8 = smin.f32 %s820_s7, %s645_s6 }
  0xf2   : > { %v371_v24 = vpop.trf.xlu0 }
  0xf3   : > { %451 = vperm.xlu1 %803, %v371_v24  }
  0xf6   : > { %v372_v25 = vpop.trf.xlu0 }
  0xf7   : > { %456 = vperm.xlu1 %803, %v372_v25  }
  0xfa   : > { %v373_v26 = vpop.trf.xlu0 }
  0xfb   : > { %461 = vperm.xlu1 %803, %v373_v26   ;;  %v396_v26 = vadd.s32 120, %v865_v3 }
  0xfe   : > { %v374_v27 = vpop.trf.xlu0 }
  0xff   : > { %466 = vperm.xlu1 %803, %v374_v27  }
 0x102   : > { %v375_v28 = vpop.trf.xlu0 }
 0x103   : > { %471 = vperm.xlu0 %804, %v375_v28  }
 0x106   : > { %v376_v29 = vpop.trf.xlu0 }
 0x107   : > { %476 = vperm.xlu1 %803, %v376_v29  }
 0x10a   : > { %v377_v30 = vpop.trf.xlu0 }
 0x10b   : > { %481 = vperm.xlu1 %803, %v377_v30  }
 0x10e   : > { %v378_v31 = vpop.trf.xlu0 }
 0x10f   : > { %486 = vperm.xlu1 %803, %v378_v31  }
 0x112   : > { %v379_v32 = vpop.trf.xlu0 }
 0x113   : > { %491 = vperm.xlu1 %803, %v379_v32  }
 0x156   : > { %v417_v33 = vpop.permute.xlu1 %416 }
 0x157   : > { %vm516_vm10 = vcmp.eq.f32.partialorder %v417_v33, %v905_v61  ;;  %vm500_vm13 = vcmp.gt.f32.partialorder %v417_v33, %v905_v61 }
 0x158   : > { %vm548_vm14 = vmand %vm516_vm10, %vm532_vm9 }
 0x159   : > { %vm924_vm5 = vmor %vm500_vm13, %vm548_vm14  ;;  %vm537_vm14 = vcmp.lt.s32.totalorder %v386_v46, %v909_v38 }
 0x15a   : > { %v422_v34 = vpop.permute.xlu1 %421  ;;  %v1029_v45 = vsel %vm924_vm5, 4294967295, %v1028_v45 }
 0x15b   : > { %vm517_vm12 = vcmp.eq.f32.partialorder %v422_v34, %v905_v61  ;;  %vm501_vm2 = vcmp.gt.f32.partialorder %v422_v34, %v905_v61 }
 0x15c   : > { %vm549_vm4 = vmand %vm517_vm12, %vm533_vm11 }
 0x15d   : > { %vm565_vm3 = vmor %vm501_vm2, %vm549_vm4  ;;  %vm538_vm4 = vcmp.lt.s32.totalorder %v387_v47, %v909_v38 }
 0x15e   : > { %v427_v35 = vpop.permute.xlu1 %426  ;;  %v768_v50 = vsel %vm565_vm3, 1.0, %v817_v11 }
 0x15f   : > { %vm518_vm0 = vcmp.eq.f32.partialorder %v427_v35, %v905_v61  ;;  %vm502_vm9 = vcmp.gt.f32.partialorder %v427_v35, %v905_v61 }
 0x160   : > { %vm550_vm10 = vmand %vm518_vm0, %vm534_vm15 }
 0x161   : > { %vm566_vm13 = vmor %vm502_vm9, %vm550_vm10 }
 0x162   : > { %v432_v36 = vpop.permute.xlu1 %431  ;;  %v769_v53 = vsel %vm566_vm13, 1.0, %v817_v11 }
 0x163   : > { %vm519_vm7 = vcmp.eq.f32.partialorder %v432_v36, %v905_v61  ;;  %vm503_vm11 = vcmp.gt.f32.partialorder %v432_v36, %v905_v61 }
 0x164   : > { %vm551_vm12 = vmand %vm519_vm7, %vm535_vm6  ;;  %vm1030_vm7 = vnez %v1029_v45 }
 0x165   : > { %vm567_vm2 = vmor %vm503_vm11, %vm551_vm12  ;;  %v767_v52 = vsel %vm1030_vm7, 1.0, %v817_v11  ;;  %vm541_vm7 = vcmp.lt.s32.totalorder %v390_v56, %v909_v38 }
 0x166   : > { %v437_v37 = vpop.permute.xlu1 %436  ;;  %v612_v55 = vadd.f32 %v768_v50, %v767_v52  ;;  %v770_v57 = vsel %vm567_vm2, 1.0, %v817_v11  ;;  %v662_v50 = vstv %s999_s30 }
 0x167   : > { %vm520_vm1 = vcmp.eq.f32.partialorder %v437_v37, %v905_v61  ;;  %vm504_vm15 = vcmp.gt.f32.partialorder %v437_v37, %v905_v61 }
 0x168   : > { %vm552_vm0 = vmand %vm520_vm1, %vm536_vm8  ;;  %vm539_vm1 = vcmp.lt.s32.totalorder %v388_v49, %v909_v38  ;;  %v613_v59 = vadd.f32 %v769_v53, %v612_v55 }
 0x169   : > { %vm568_vm3 = vmor %vm504_vm15, %vm552_vm0 }
 0x16a   : > { %v442_v39 = vpop.permute.xlu1 %441  ;;  %v771_v62 = vsel %vm568_vm3, 1.0, %v817_v11  ;;  %v614_v1 = vadd.f32 %v770_v57, %v613_v59  ;;  %vm542_vm3 = vcmp.lt.s32.totalorder %v391_v60, %v909_v38 }
 0x16b   : > { %vm521_vm5 = vcmp.eq.f32.partialorder %v442_v39, %v905_v61  ;;  %vm505_vm9 = vcmp.gt.f32.partialorder %v442_v39, %v905_v61 }
 0x16c   : > { %vm553_vm10 = vmand %vm521_vm5, %vm537_vm14  ;;  %vm540_vm5 = vcmp.lt.s32.totalorder %v389_v51, %v909_v38  ;;  %v615_v6 = vadd.f32 %v771_v62, %v614_v1 }
 0x16d   : > { %vm569_vm13 = vmor %vm505_vm9, %vm553_vm10 }
 0x16e   : > { %v447_v42 = vpop.permute.xlu1 %446  ;;  %v772_v4 = vsel %vm569_vm13, 1.0, %v817_v11  ;;  %vm543_vm13 = vcmp.lt.s32.totalorder %v392_v2, %v909_v38 }
 0x16f   : > { %vm522_vm6 = vcmp.eq.f32.partialorder %v447_v42, %v905_v61  ;;  %vm506_vm11 = vcmp.gt.f32.partialorder %v447_v42, %v905_v61  ;;  %v616_v10 = vadd.f32 %v772_v4, %v615_v6  ;;  %v647_v42 = vstv %s646_s8 }
 0x170   : > { %vm554_vm12 = vmand %vm522_vm6, %vm538_vm4 }
 0x171   : > { %vm570_vm2 = vmor %vm506_vm11, %vm554_vm12 }
 0x172   : > { %v452_v44 = vpop.permute.xlu1 %451  ;;  %v773_v8 = vsel %vm570_vm2, 1.0, %v817_v11  ;;  %vm544_vm2 = vcmp.lt.s32.totalorder %v393_v7, %v909_v38 }
 0x173   : > { %vm523_vm8 = vcmp.eq.f32.partialorder %v452_v44, %v905_v61  ;;  %vm507_vm15 = vcmp.gt.f32.partialorder %v452_v44, %v905_v61  ;;  %v617_v13 = vadd.f32 %v773_v8, %v616_v10 }
 0x174   : > { %vm555_vm0 = vmand %vm523_vm8, %vm539_vm1 }
 0x175   : > { %vm571_vm10 = vmor %vm507_vm15, %vm555_vm0 }
 0x176   : > { %v457_v48 = vpop.permute.xlu1 %456  ;;  %v774_v12 = vsel %vm571_vm10, 1.0, %v817_v11 }
 0x177   : > { %vm524_vm14 = vcmp.eq.f32.partialorder %v457_v48, %v905_v61  ;;  %vm508_vm6 = vcmp.gt.f32.partialorder %v457_v48, %v905_v61  ;;  %v618_v18 = vadd.f32 %v774_v12, %v617_v13 }
 0x178   : > { %vm556_vm9 = vmand %vm524_vm14, %vm540_vm5 }
 0x179   : > { %vm572_vm12 = vmor %vm508_vm6, %vm556_vm9 }
 0x17a   : > { %v462_v54 = vpop.permute.xlu1 %461  ;;  %v775_v15 = vsel %vm572_vm12, 1.0, %v817_v11 }
 0x17b   : > { %vm525_vm4 = vcmp.eq.f32.partialorder %v462_v54, %v905_v61  ;;  %vm509_vm8 = vcmp.gt.f32.partialorder %v462_v54, %v905_v61  ;;  %v619_v16 = vadd.f32 %v775_v15, %v618_v18 }
 0x17c   : > { %vm557_vm11 = vmand %vm525_vm4, %vm541_vm7 }
 0x17d   : > { %vm573_vm0 = vmor %vm509_vm8, %vm557_vm11  ;;  %vm545_vm8 = vcmp.lt.s32.totalorder %v394_v14, %v909_v38 }
 0x17e   : > { %v467_v63 = vpop.permute.xlu1 %466  ;;  %v776_v19 = vsel %vm573_vm0, 1.0, %v817_v11 }
 0x17f   : > { %vm526_vm1 = vcmp.eq.f32.partialorder %v467_v63, %v905_v61  ;;  %vm510_vm14 = vcmp.gt.f32.partialorder %v467_v63, %v905_v61  ;;  %v620_v23 = vadd.f32 %v776_v19, %v619_v16 }
 0x180   : > { %vm558_vm15 = vmand %vm526_vm1, %vm542_vm3 }
 0x181   : > { %vm574_vm6 = vmor %vm510_vm14, %vm558_vm15  ;;  %vm546_vm15 = vcmp.lt.s32.totalorder %v395_v20, %v909_v38 }
 0x182   : > { %v472_v9 = vpop.permute.xlu0 %471  ;;  %v777_v21 = vsel %vm574_vm6, 1.0, %v817_v11  ;;  %vm547_vm6 = vcmp.lt.s32.totalorder %v396_v26, %v909_v38 }
 0x183   : > { %vm527_vm5 = vcmp.eq.f32.partialorder %v472_v9, %v905_v61  ;;  %vm511_vm7 = vcmp.gt.f32.partialorder %v472_v9, %v905_v61  ;;  %v621_v25 = vadd.f32 %v777_v21, %v620_v23 }
 0x184   : > { %vm559_vm4 = vmand %vm527_vm5, %vm543_vm13 }
 0x185   : > { %vm575_vm1 = vmor %vm511_vm7, %vm559_vm4 }
 0x186   : > { %v477_v17 = vpop.permute.xlu1 %476  ;;  %v778_v24 = vsel %vm575_vm1, 1.0, %v817_v11 }
 0x187   : > { %vm528_vm9 = vcmp.eq.f32.partialorder %v477_v17, %v905_v61  ;;  %vm512_vm10 = vcmp.gt.f32.partialorder %v477_v17, %v905_v61  ;;  %v622_v29 = vadd.f32 %v778_v24, %v621_v25 }
 0x188   : > { %vm560_vm3 = vmand %vm528_vm9, %vm544_vm2 }
 0x189   : > { %vm576_vm11 = vmor %vm512_vm10, %vm560_vm3 }
 0x18a   : > { %v482_v22 = vpop.permute.xlu1 %481  ;;  %v779_v27 = vsel %vm576_vm11, 1.0, %v817_v11  ;;  %vm1031_vm11 = vcmp.gt.s32.totalorder %v875_v5, 0 }
 0x18b   : > { %vm513_vm12 = vcmp.gt.f32.partialorder %v482_v22, %v905_v61  ;;  %vm529_vm13 = vcmp.eq.f32.partialorder %v482_v22, %v905_v61  ;;  %v623_v31 = vadd.f32 %v779_v27, %v622_v29 }
 0x18c   : > { %vm561_vm5 = vmand %vm529_vm13, %vm545_vm8  ;;  %vm1032_vm13 = vcmp.ge.s32.totalorder %v875_v5, 0 }
 0x18d   : > { %vm577_vm14 = vmor %vm513_vm12, %vm561_vm5 }
 0x18e   : > { %v487_v28 = vpop.permute.xlu1 %486  ;;  %v780_v30 = vsel %vm577_vm14, 1.0, %v817_v11  ;;  %vm1033_vm14 = vcmask 1040384  }
 0x18f   : > { %vm514_vm0 = vcmp.gt.f32.partialorder %v487_v28, %v905_v61  ;;  %vm530_vm2 = vcmp.eq.f32.partialorder %v487_v28, %v905_v61  ;;  %v624_v34 = vadd.f32 %v780_v30, %v623_v31 }
 0x190   : > { %vm562_vm7 = vmand %vm530_vm2, %vm546_vm15  ;;  %vm666_vm15 = vcmask 1041408  }
 0x191   : > { %vm578_vm4 = vmor %vm514_vm0, %vm562_vm7 }
 0x192   : > { %v781_v32 = vsel %vm578_vm4, 1.0, %v817_v11  ;;  %v492_v33 = vpop.permute.xlu1 %491  ;;  %vm1034_vm0 = vmmov %vm1033_vm14 }
 0x193   : > { %vm515_vm9 = vcmp.gt.f32.partialorder %v492_v33, %v905_v61  ;;  %vm531_vm10 = vcmp.eq.f32.partialorder %v492_v33, %v905_v61  ;;  %v625_v3 = vadd.f32 %v781_v32, %v624_v34 }
 0x194   : > { %vm563_vm3 = vmand %vm531_vm10, %vm547_vm6 }
 0x195   : > { %vm579_vm1 = vmor %vm515_vm9, %vm563_vm3 }
 0x196   : > { %v782_v35 = vsel %vm579_vm1, 1.0, %v817_v11 }
 0x197   : > { %v626_v36 = vadd.f32 %v782_v35, %v625_v3 }
 0x199   : > { %v627_v37 = vrot.slane %v626_v36, 4 }
 0x19b   : > { %v628_v38 = vadd.f32 %v627_v37, %v626_v36 }
 0x19d   : > { %v629_v39 = vrot.slane %v628_v38, 2 }
 0x19f   : > { %v630_v40 = vadd.f32 %v629_v39, %v628_v38 }
 0x1a1   : > { %v631_v41 = vrot.slane %v630_v40, 1 }
 0x1a3   : > { %v632_v61 = vadd.f32 %v631_v41, %v630_v40 }
 0x1a5   : > { %vm648_vm8 = vcmp.lt.f32.partialorder %v632_v61, %v647_v42 }
 0x1a6   : > { %vm649_vm12 = vmor %vm1031_vm11, %vm648_vm8 }
 0x1a7   : > { %vm650_vm5 = vmand %vm649_vm12, %vm1032_vm13 }
 0x1a8   : > { %v651_v11 = vsel %vm650_vm5, %v896_v58, 0.0  ;;  %v664_v58 = vstv %s1001_s5 }
 0x1a9   : > { %v652_v43 = vsel %vm1033_vm14, %v651_v11, 0.0 }
 0x1aa   : > { %653 = vadd.xlane.f32.xlu1 %v652_v43 }
 0x237   : > { %v654_v0 = vpop.xlane.xlu1 %653 }
 0x238   : > { %v655_v44 = vrot.slane %v654_v0, 4 }
 0x23a   : > { %v656_v45 = vadd.f32 %v655_v44, %v654_v0 }
 0x23c   : > { %v657_v46 = vrot.slane %v656_v45, 2 }
 0x23e   : > { %v658_v47 = vadd.f32 %v657_v46, %v656_v45 }
 0x240   : > { %v659_v48 = vrot.slane %v658_v47, 1 }
 0x242   : > { %v660_v49 = vadd.f32 %v659_v48, %v658_v47 }
 0x244   : > { %789 = vpush %v660_v49 }
 0x275   : > { %s790_s9 = spop %789 }
 0x276   : > { %v663_v5 = vstv %s790_s9 }
 0x277   : > { %v665_v51 = vsel %vm1034_vm0, %v662_v50, %v663_v5 }
 0x278   : > { %v667_v52 = vsel %vm666_vm15, %v665_v51, %v664_v58 }
 0x279   : > { %668 = vst [vmem:[%s240_s12] sm:$0x7] %v667_v52 }
 0x27a PF: > { %s14_s15 = sadd.s32 1, %s815_s15  }
 0x27b   : > { %p11_p4 = scmp.ge.s32.totalorder %s14_s15, 4  }
 0x27d   :  { %13 = sbr.rel (!%p11_p4) target bundleno = 1 (0x1), region = 75 }

</bundles_post_ra>
